<compile_context>
chip_gen: v7x
topology: tpu7x:2x2x1
jax: 0.10.0
libtpu: 0.0.40
codegen_flags: <defaults>
</compile_context>

<pallas_src>
import functools

import jax
import jax.numpy as jnp
from jax import lax
from jax.experimental import pallas as pl
from jax.experimental.pallas import tpu as pltpu


def _round_up(x: int, m: int) -> int:
    return ((x + m - 1) // m) * m


def _activation(y, last: bool):
    if last:
        return jax.nn.sigmoid(y)
    return jnp.where(y >= 0.0, y, 0.2 * y)  # LeakyReLU(0.2)


# -------- pass 1 (norm path): K-tiled matmul + per-tile BN partial stats ----

def _mm_stats_kernel(p_ref, w_ref, y_ref, sum_ref, sq_ref, acc_ref):
    # p_ref: [TM, TK] bf16, w_ref: [TK, Cp] bf16, acc_ref: [TM, Cp] f32
    # y_ref: [TM, Cp] (bf16 intermediate), sum/sq_ref: [1, 8, Cp] f32 partials
    @pl.when(pl.program_id(1) == 0)
    def _init():
        acc_ref[...] = jnp.zeros_like(acc_ref)

    acc_ref[...] += jnp.dot(p_ref[...], w_ref[...],
                            preferred_element_type=jnp.float32)

    @pl.when(pl.program_id(1) == pl.num_programs(1) - 1)
    def _finalize():
        y = acc_ref[...]                                   # exact f32 conv out
        y_ref[...] = y.astype(y_ref.dtype)
        tm, cp = y.shape
        yr = y.reshape(tm // 8, 8, cp)
        sum_ref[...] = jnp.sum(yr, axis=0)[None]           # 8 sublane partials
        sq_ref[...] = jnp.sum(yr * yr, axis=0)[None]


# -------- pass 1 (no-norm path): K-tiled matmul + activation ----------------

def _mm_act_kernel(p_ref, w_ref, o_ref, acc_ref, *, last: bool):
    @pl.when(pl.program_id(1) == 0)
    def _init():
        acc_ref[...] = jnp.zeros_like(acc_ref)

    acc_ref[...] += jnp.dot(p_ref[...], w_ref[...],
                            preferred_element_type=jnp.float32)

    @pl.when(pl.program_id(1) == pl.num_programs(1) - 1)
    def _finalize():
        o_ref[...] = _activation(acc_ref[...], last).astype(o_ref.dtype)


# -------- pass 2: lane-dense affine BN + activation (bandwidth-bound) -------

def _bn_act_kernel(y_ref, scale_ref, shift_ref, o_ref, *, last: bool):
    y = y_ref[...].astype(jnp.float32) * scale_ref[...] + shift_ref[...]
    o_ref[...] = _activation(y, last).astype(o_ref.dtype)


def block_forward(x, weight, gamma, beta, *, stride: int, padding: int,
                  norm: bool = True, last: bool = False,
                  tile_m: int = 512, tile_k: int = 512,
                  compute_dtype=jnp.bfloat16,      # MXU input dtype
                  inter_dtype=jnp.bfloat16,        # pass-1 -> pass-2 dtype
                  out_dtype=jnp.float32,
                  out_nchw: bool = True):
    """x: [N, Cin, H, W] (NCHW).  weight: [Cout, Cin, kh, kw]."""
    N, Cin, H, W = x.shape
    Cout, _, kh, kw = weight.shape
    OH = (H + 2 * padding - kh) // stride + 1
    OW = (W + 2 * padding - kw) // stride + 1
    M = N * OH * OW
    K = Cin * kh * kw
    Cp = _round_up(max(Cout, 128), 128)              # lane-dense output columns

    # ---- tiling (K reduction axis + parallel M axis) ----
    tile_m = max(16, _round_up(tile_m, 16))
    tile_k = max(128, _round_up(tile_k, 128))
    TK = min(tile_k, _round_up(K, 128))
    Kp = _round_up(K, TK)
    nkt = Kp // TK
    TM = tile_m if M >= tile_m else _round_up(M, 16)
    Mp = _round_up(M, TM)
    nt = Mp // TM

    # ---- im2col in one shot, channel-last, (cin, kh, kw) column order ----
    x_c = x.astype(compute_dtype)
    patches = lax.conv_general_dilated_patches(
        x_c, (kh, kw), (stride, stride), [(padding, padding)] * 2,
        dimension_numbers=("NCHW", "OIHW", "NHWC"))   # [N, OH, OW, K]
    patches = patches.reshape(M, K)
    if (Mp, Kp) != (M, K):
        patches = jnp.pad(patches, ((0, Mp - M), (0, Kp - K)))

    # weight [Cout, Cin, kh, kw] -> [K, Cp] with matching (cin, kh, kw) rows
    w_mat = jnp.transpose(weight.reshape(Cout, K)).astype(compute_dtype)
    w_mat = jnp.pad(w_mat, ((0, Kp - K), (0, Cp - Cout)))

    isz = jnp.dtype(compute_dtype).itemsize
    ysz = jnp.dtype(inter_dtype).itemsize
    osz = jnp.dtype(out_dtype).itemsize

    cparams_mm = pltpu.CompilerParams(
        dimension_semantics=("parallel", "arbitrary"),
        vmem_limit_bytes=48 * 1024 * 1024)            # fits v7x's 64 MiB VMEM
    cparams_ew = pltpu.CompilerParams(
        dimension_semantics=("parallel",),
        vmem_limit_bytes=48 * 1024 * 1024)

    mm_in_specs = [
        pl.BlockSpec((TM, TK), lambda i, k: (i, k)),
        pl.BlockSpec((TK, Cp), lambda i, k: (k, 0)),
    ]
    mm_cost = pl.CostEstimate(
        flops=2 * Mp * Kp * Cp,
        transcendentals=(Mp * Cp if (last and not norm) else 0),
        bytes_accessed=(Mp * Kp + nt * Kp * Cp) * isz
                       + Mp * Cp * (ysz if norm else osz)
                       + (2 * nt * 8 * Cp * 4 if norm else 0))

    if norm:
        y, psum, psq = pl.pallas_call(
            _mm_stats_kernel,
            grid=(nt, nkt),
            in_specs=mm_in_specs,
            out_specs=[
                pl.BlockSpec((TM, Cp), lambda i, k: (i, 0)),
                pl.BlockSpec((1, 8, Cp), lambda i, k: (i, 0, 0)),
                pl.BlockSpec((1, 8, Cp), lambda i, k: (i, 0, 0)),
            ],
            out_shape=[
                jax.ShapeDtypeStruct((Mp, Cp), inter_dtype),
                jax.ShapeDtypeStruct((nt, 8, Cp), jnp.float32),
                jax.ShapeDtypeStruct((nt, 8, Cp), jnp.float32),
            ],
            scratch_shapes=[pltpu.VMEM((TM, Cp), jnp.float32)],
            compiler_params=cparams_mm,
            cost_estimate=mm_cost,
        )(patches, w_mat)

        # exact global (N, H, W) training-mode batch statistics (tiny reduce)
        s = jnp.sum(psum, axis=(0, 1))                 # [Cp]
        sq = jnp.sum(psq, axis=(0, 1))                 # [Cp]
        mean = s / M
        var = jnp.maximum(sq / M - mean * mean, 0.0)   # biased var, clamped
        gamma_p = jnp.pad(gamma.astype(jnp.float32), (0, Cp - Cout),
                          constant_values=1.0)
        beta_p = jnp.pad(beta.astype(jnp.float32), (0, Cp - Cout))
        scale = (gamma_p * lax.rsqrt(var + 1e-5)).reshape(1, Cp)
        shift = (beta_p - mean * scale[0]).reshape(1, Cp)

        io_alias = ({0: 0} if jnp.dtype(inter_dtype) == jnp.dtype(out_dtype)
                    else {})
        out = pl.pallas_call(
            functools.partial(_bn_act_kernel, last=last),
            grid=(nt,),
            in_specs=[
                pl.BlockSpec((TM, Cp), lambda i: (i, 0)),
                pl.BlockSpec((1, Cp), lambda i: (0, 0)),   # resident scale
                pl.BlockSpec((1, Cp), lambda i: (0, 0)),   # resident shift
            ],
            out_specs=pl.BlockSpec((TM, Cp), lambda i: (i, 0)),
            out_shape=jax.ShapeDtypeStruct((Mp, Cp), out_dtype),
            input_output_aliases=io_alias,
            compiler_params=cparams_ew,
            cost_estimate=pl.CostEstimate(
                flops=2 * Mp * Cp,
                transcendentals=Mp * Cp if last else 0,
                bytes_accessed=Mp * Cp * (ysz + osz) + 2 * Cp * 4),
        )(y, scale, shift)
    else:
        out = pl.pallas_call(
            functools.partial(_mm_act_kernel, last=last),
            grid=(nt, nkt),
            in_specs=mm_in_specs,
            out_specs=pl.BlockSpec((TM, Cp), lambda i, k: (i, 0)),
            out_shape=jax.ShapeDtypeStruct((Mp, Cp), out_dtype),
            scratch_shapes=[pltpu.VMEM((TM, Cp), jnp.float32)],
            compiler_params=cparams_mm,
            cost_estimate=mm_cost,
        )(patches, w_mat)

    # TODO(synk): when chaining Blocks, keep the Cp-padded channel-last slab
    #             (skip this slice/transpose) and pad the next layer's weight.
    out = out[:M, :Cout].reshape(N, OH, OW, Cout)       # kernel-native NHWC
    if out_nchw:
        out = jnp.transpose(out, (0, 3, 1, 2))          # only at the boundary
    return out


# ---------------- pure-JAX reference for correctness check ------------------

def _ref_block(x, weight, gamma, beta, stride, padding, norm, last):
    y = lax.conv_general_dilated(
        x, weight, (stride, stride), [(padding, padding)] * 2,
        dimension_numbers=("NCHW", "OIHW", "NCHW"),
        precision=lax.Precision.HIGHEST)
    if norm:
        mean = jnp.mean(y, axis=(0, 2, 3), keepdims=True)
        var = jnp.mean((y - mean) ** 2, axis=(0, 2, 3), keepdims=True)
        y = (y - mean) * lax.rsqrt(var + 1e-5)
        y = y * gamma.reshape(1, -1, 1, 1) + beta.reshape(1, -1, 1, 1)
    return jax.nn.sigmoid(y) if last else jnp.where(y >= 0.0, y, 0.2 * y)


if __name__ == "__main__":
    # Block(channels_in=4, channels_out=8, kernel_size=4, stride=2, padding=1)
    N, Cin, H, W = 2, 4, 16, 16
    Cout, ksize, stride, padding = 8, 4, 2, 1

    key = jax.random.PRNGKey(0)
    kx, kw_, kx3, kw3 = jax.random.split(key, 4)
    x = jax.random.normal(kx, (N, Cin, H, W), dtype=jnp.float32)
    weight = jax.random.normal(kw_, (Cout, Cin, ksize, ksize),
                               dtype=jnp.float32) * 0.1
    gamma = jnp.ones((Cout,), dtype=jnp.float32)   # BatchNorm2d default init
    beta = jnp.zeros((Cout,), dtype=jnp.float32)

    # bf16 MXU path drifts ~1e-2 vs the f32 reference -> tolerance accounts for it
    TOL = dict(atol=4e-2, rtol=4e-2)

    # main path: conv -> BN (batch stats) -> LeakyReLU(0.2)
    y = block_forward(x, weight, gamma, beta, stride=stride, padding=padding,
                      norm=True, last=False)
    jax.block_until_ready(y)
    assert y.shape == (N, Cout, H // 2, W // 2), y.shape
    y_ref = _ref_block(x, weight, gamma, beta, stride, padding, True, False)
    assert jnp.allclose(y, y_ref, **TOL), float(jnp.max(jnp.abs(y - y_ref)))

    # last-block path: conv -> Sigmoid (no norm)
    y2 = block_forward(x, weight, gamma, beta, stride=stride, padding=padding,
                       norm=False, last=True)
    jax.block_until_ready(y2)
    y2_ref = _ref_block(x, weight, gamma, beta, stride, padding, False, True)
    assert jnp.allclose(y2, y2_ref, **TOL), float(jnp.max(jnp.abs(y2 - y2_ref)))

    # multi-tile path: exercises M tiling, K-axis accumulation and the
    # cross-tile BN stats reduction (Cin=16 -> K=256 -> 2 K-steps w/ tile_k=128).
    Cin3, Cout3 = 16, 32
    x3 = jax.random.normal(kx3, (N, Cin3, H, W), dtype=jnp.float32)
    w3 = jax.random.normal(kw3, (Cout3, Cin3, ksize, ksize),
                           dtype=jnp.float32) * 0.05
    g3 = jnp.full((Cout3,), 1.25, dtype=jnp.float32)
    b3 = jnp.full((Cout3,), 0.1, dtype=jnp.float32)
    y3 = block_forward(x3, w3, g3, b3, stride=stride, padding=padding,
                       norm=True, last=False, tile_m=64, tile_k=128)
    jax.block_until_ready(y3)
    y3_ref = _ref_block(x3, w3, g3, b3, stride, padding, True, False)
    assert y3.shape == (N, Cout3, H // 2, W // 2), y3.shape
    assert jnp.allclose(y3, y3_ref, **TOL), float(jnp.max(jnp.abs(y3 - y3_ref)))

    print("KERNEL_OK")
</pallas_src>

<mosaic_0001>
module attributes {stable_mosaic.version = 11 : i64} {
  func.func @_mm_stats_kernel(%arg0: i32, %arg1: i32, %arg2: memref<128x128xbf16, #tpu.memory_space<vmem>>, %arg3: memref<128x128xbf16, #tpu.memory_space<vmem>>, %arg4: memref<128x128xbf16, #tpu.memory_space<vmem>>, %arg5: memref<1x8x128xf32, #tpu.memory_space<vmem>>, %arg6: memref<1x8x128xf32, #tpu.memory_space<vmem>>, %arg7: memref<128x128xf32, #tpu.memory_space<vmem>>) attributes {dimension_semantics = [#tpu.dimension_semantics<parallel>, #tpu.dimension_semantics<arbitrary>], iteration_bounds = array<i64: 1, 1>, scalar_prefetch = 0 : i64, scratch_operands = 1 : i64, tpu.core_type = #tpu.core_type<tc>, window_params = [{transform_indices = @transform_0, window_bounds = array<i64: 128, 128>}, {transform_indices = @transform_1, window_bounds = array<i64: 128, 128>}, {transform_indices = @transform_2, window_bounds = array<i64: 128, 128>}, {transform_indices = @transform_3, window_bounds = array<i64: 1, 8, 128>}, {transform_indices = @transform_4, window_bounds = array<i64: 1, 8, 128>}]} {
    %c0_i32 = arith.constant 0 : i32
    %0 = arith.cmpi eq, %arg1, %c0_i32 : i32
    %1 = arith.extui %0 : i1 to i32
    %c0_i32_0 = arith.constant 0 : i32
    %2 = arith.cmpi ne, %1, %c0_i32_0 : i32
    scf.if %2 {
      %cst_10 = arith.constant 0.000000e+00 : f32
      %12 = vector.broadcast %cst_10 : f32 to vector<128x128xf32>
      %c0_11 = arith.constant 0 : index
      %c0_12 = arith.constant 0 : index
      %13 = vector.load %arg7[%c0_11, %c0_12] : memref<128x128xf32, #tpu.memory_space<vmem>>, vector<128x128xf32>
      tpu.vector_store %arg7[%c0_11, %c0_12], %12 {strides = array<i32>} : memref<128x128xf32, #tpu.memory_space<vmem>>, vector<128x128xf32>,
    } else {
    }
    %c0 = arith.constant 0 : index
    %c0_1 = arith.constant 0 : index
    %3 = vector.load %arg7[%c0, %c0_1] : memref<128x128xf32, #tpu.memory_space<vmem>>, vector<128x128xf32>
    %c0_2 = arith.constant 0 : index
    %c0_3 = arith.constant 0 : index
    %4 = vector.load %arg2[%c0_2, %c0_3] : memref<128x128xbf16, #tpu.memory_space<vmem>>, vector<128x128xbf16>
    %c0_4 = arith.constant 0 : index
    %c0_5 = arith.constant 0 : index
    %5 = vector.load %arg3[%c0_4, %c0_5] : memref<128x128xbf16, #tpu.memory_space<vmem>>, vector<128x128xbf16>
    %cst = arith.constant dense<0.000000e+00> : vector<128x128xf32>
    %6 = tpu.matmul %4, %5, %cst {dimension_numbers = #tpu.dot_dimension_numbers<[1], [0], [0], [1], [0, 0, 1, 1], [], []>} : vector<128x128xbf16>, vector<128x128xbf16>, vector<128x128xf32> -> vector<128x128xf32>
    %7 = arith.addf %3, %6 : vector<128x128xf32>
    %c0_6 = arith.constant 0 : index
    %c0_7 = arith.constant 0 : index
    %8 = vector.load %arg7[%c0_6, %c0_7] : memref<128x128xf32, #tpu.memory_space<vmem>>, vector<128x128xf32>
    tpu.vector_store %arg7[%c0_6, %c0_7], %7 {strides = array<i32>} : memref<128x128xf32, #tpu.memory_space<vmem>>, vector<128x128xf32>,
    %c0_i32_8 = arith.constant 0 : i32
    %9 = arith.cmpi eq, %arg1, %c0_i32_8 : i32
    %10 = arith.extui %9 : i1 to i32
    %c0_i32_9 = arith.constant 0 : i32
    %11 = arith.cmpi ne, %10, %c0_i32_9 : i32
    scf.if %11 {
      %c0_10 = arith.constant 0 : index
      %c0_11 = arith.constant 0 : index
      %12 = vector.load %arg7[%c0_10, %c0_11] : memref<128x128xf32, #tpu.memory_space<vmem>>, vector<128x128xf32>
      %13 = arith.truncf %12 : vector<128x128xf32> to vector<128x128xbf16>
      %c0_12 = arith.constant 0 : index
      %c0_13 = arith.constant 0 : index
      %14 = vector.load %arg4[%c0_12, %c0_13] : memref<128x128xbf16, #tpu.memory_space<vmem>>, vector<128x128xbf16>
      tpu.vector_store %arg4[%c0_12, %c0_13], %13 {strides = array<i32>} : memref<128x128xbf16, #tpu.memory_space<vmem>>, vector<128x128xbf16>,
      %15 = vector.shape_cast %12 : vector<128x128xf32> to vector<16x8x128xf32>
      %cst_14 = arith.constant dense<0.000000e+00> : vector<8x128xf32>
      %16 = vector.multi_reduction <add>, %15, %cst_14 [0] : vector<16x8x128xf32> to vector<8x128xf32>
      %17 = vector.shape_cast %16 : vector<8x128xf32> to vector<1x8x128xf32>
      %c0_15 = arith.constant 0 : index
      %c0_16 = arith.constant 0 : index
      %c0_17 = arith.constant 0 : index
      %18 = vector.load %arg5[%c0_15, %c0_16, %c0_17] : memref<1x8x128xf32, #tpu.memory_space<vmem>>, vector<1x8x128xf32>
      tpu.vector_store %arg5[%c0_15, %c0_16, %c0_17], %17 {strides = array<i32>} : memref<1x8x128xf32, #tpu.memory_space<vmem>>, vector<1x8x128xf32>,
      %19 = arith.mulf %15, %15 : vector<16x8x128xf32>
      %cst_18 = arith.constant dense<0.000000e+00> : vector<8x128xf32>
      %20 = vector.multi_reduction <add>, %19, %cst_18 [0] : vector<16x8x128xf32> to vector<8x128xf32>
      %21 = vector.shape_cast %20 : vector<8x128xf32> to vector<1x8x128xf32>
      %c0_19 = arith.constant 0 : index
      %c0_20 = arith.constant 0 : index
      %c0_21 = arith.constant 0 : index
      %22 = vector.load %arg6[%c0_19, %c0_20, %c0_21] : memref<1x8x128xf32, #tpu.memory_space<vmem>>, vector<1x8x128xf32>
      tpu.vector_store %arg6[%c0_19, %c0_20, %c0_21], %21 {strides = array<i32>} : memref<1x8x128xf32, #tpu.memory_space<vmem>>, vector<1x8x128xf32>,
    } else {
    }
    return
  }
  func.func @transform_0(%arg0: i32, %arg1: i32) -> (i32, i32) {
    %c0_i32 = arith.constant 0 : i32
    return %arg0, %arg1 : i32, i32
  }
  func.func @transform_1(%arg0: i32, %arg1: i32) -> (i32, i32) {
    %c0_i32 = arith.constant 0 : i32
    %c0_i32_0 = arith.constant 0 : i32
    return %arg1, %c0_i32 : i32, i32
  }
  func.func @transform_2(%arg0: i32, %arg1: i32) -> (i32, i32) {
    %c0_i32 = arith.constant 0 : i32
    %c0_i32_0 = arith.constant 0 : i32
    return %arg0, %c0_i32 : i32, i32
  }
  func.func @transform_3(%arg0: i32, %arg1: i32) -> (i32, i32, i32) {
    %c0_i32 = arith.constant 0 : i32
    %c0_i32_0 = arith.constant 0 : i32
    %c0_i32_1 = arith.constant 0 : i32
    return %arg0, %c0_i32, %c0_i32_0 : i32, i32, i32
  }
  func.func @transform_4(%arg0: i32, %arg1: i32) -> (i32, i32, i32) {
    %c0_i32 = arith.constant 0 : i32
    %c0_i32_0 = arith.constant 0 : i32
    %c0_i32_1 = arith.constant 0 : i32
    return %arg0, %c0_i32, %c0_i32_0 : i32, i32, i32
  }
}

</mosaic_0001>

<bundles_post_ra>
// kernel: tpu_custom_call.1
= control target key start
LH: loop header
LB: loop body
LE: loop exit
PB: predicated region body
PF: predicated region fallthrough
CT: control target
= control target key end

     0   :  { %10 = vsyncpa [#allocation4], 0  ;;  %s967_s0 = inlined_call_operand.hbm [shape: bf16[128,128], index: 0, kind: input, shape index: {}]   ;;  %s968_s1 = inlined_call_operand.hbm [shape: bf16[128,128], index: 1, kind: input, shape index: {}]   ;;  %s969_s2 = inlined_call_operand.hbm [shape: bf16[128,128], index: 2, kind: output, shape index: {0}]   ;;  %s970_s3 = inlined_call_operand.hbm [shape: f32[1,8,128], index: 3, kind: output, shape index: {1}]   ;;  %s971_s4 = inlined_call_operand.hbm [shape: f32[1,8,128], index: 4, kind: output, shape index: {2}]  }
   0x1   :  { %11 = vsyncpa [#allocation7], 0 }
   0x2   :  { %12 = vsyncpa [#allocation5], 0 }
   0x3   :  { %13 = vsyncpa [#allocation10], 0  ;;  %s830_s15 = smov [#allocation3]   ;;  %s712_s19 = scalar_lea.hbm %s967_s0, 1024 }
   0x4   :  { %s19_s16 = sshll.u32 %s830_s15, 4  ;;  %p713_p0 = scmp.ne.s32.totalorder %s967_s0, %s712_s19  ;;  %s20_s16 = int_to_ptr.vmem [resolvable:$true] %s19_s16 }
   0x5   :  { %p716_p1 = scmp.lt.u32.totalorder %s712_s19, %s967_s0 }
   0x7   :  { %p718_p2 = pnand %p716_p1, %p713_p0 }
   0x9   :  { %721 = shalt.err (!%p718_p2)
}
   0xa   :  { %s722_s24 = scalar_lea.vmem %s20_s16, 1024  ;;  %p727_p4 = scmp.lt.s32.totalorder %s20_s16, %s20_s16 }
   0xb   :  { %p723_p3 = scmp.ne.s32.totalorder %s20_s16, %s722_s24  ;;  %p728_p5 = scmp.lt.s32.totalorder %s722_s24, %s722_s24 }
   0xd   :  { %p729_p6 = por %p728_p5, %p727_p4 }
   0xf   :  { %p730_p7 = pnand %p729_p6, %p723_p3 }
  0x11   :  { %733 = shalt.err (!%p730_p7)
}
  0x12   :  { %s831_s25 = smov 64   ;;  %s832_s26 = smov 4  }
  0x13   :  { %25 = dma.hbm_to_vmem [thread:$0]  %s967_s0, 1024, %s20_s16, [#allocation4], %s831_s25, %s831_s25, %s832_s26  }
  0x14   :  { %s833_s29 = smov [#allocation6]   ;;  %s734_s7 = scalar_lea.hbm %s968_s1, 1024 }
  0x15   :  { %s31_s30 = sshll.u32 %s833_s29, 4  ;;  %p735_p8 = scmp.ne.s32.totalorder %s968_s1, %s734_s7  ;;  %s32_s30 = int_to_ptr.vmem [resolvable:$true] %s31_s30 }
  0x16   :  { %p738_p9 = scmp.lt.u32.totalorder %s734_s7, %s968_s1 }
  0x18   :  { %p740_p10 = pnand %p738_p9, %p735_p8 }
  0x1a   :  { %743 = shalt.err (!%p740_p10)
}
  0x1b   :  { %s744_s12 = scalar_lea.vmem %s32_s30, 1024  ;;  %p749_p12 = scmp.lt.s32.totalorder %s32_s30, %s32_s30 }
  0x1c   :  { %p745_p11 = scmp.ne.s32.totalorder %s32_s30, %s744_s12  ;;  %p750_p13 = scmp.lt.s32.totalorder %s744_s12, %s744_s12 }
  0x1e   :  { %p751_p0 = por %p750_p13, %p749_p12 }
  0x20   :  { %p752_p1 = pnand %p751_p0, %p745_p11 }
  0x22   :  { %755 = shalt.err (!%p752_p1)
}
  0x23   :  { %37 = dma.hbm_to_vmem [thread:$0]  %s968_s1, 1024, %s32_s30, [#allocation7], %s831_s25, %s831_s25, %s832_s26  }
  0x24   :  { %822 = dma.done.wait [#allocation4], 1024  }
  0x25   :  { %823 = vsyncadd [#allocation4], 4294966272 }
  0x26   :  { %824 = dma.done.wait [#allocation7], 1024  }
  0x27   :  { %825 = vsyncadd [#allocation7], 4294966272  ;;  %v696_v0 = vld [vmem:[#allocation6] sm:$0xff]   ;;  %v697_v1 = vld [vmem:[#allocation6 + $0x8] sm:$0xff]   ;;  %s834_s1 = smov [#allocation8]  }
  0x28   :  { %641 = vmatprep.subr.bf16.mxu0 %v696_v0  ;;  %673 = vmatprep.subr.bf16.mxu1 %v696_v0  ;;  %v698_v2 = vld [vmem:[#allocation6 + $0x10] sm:$0xff]   ;;  %v699_v3 = vld [vmem:[#allocation6 + $0x18] sm:$0xff]   ;;  %v704_v4 = vld [vmem:[#allocation3] sm:$0xff]   ;;  %s490_s14 = sshll.u32 %s834_s1, 4  ;;  %s491_s14 = int_to_ptr.vmem [resolvable:$true] %s490_s14 }
  0x29   :  { %642 = vmatpush3.bf16.msra.mxu0 %v696_v0  ;;  %681 = vmatpush3.bf16.msra.mxu1 %v696_v0  ;;  %v700_v5 = vld [vmem:[#allocation6 + $0x20] sm:$0xff]   ;;  %v701_v7 = vld [vmem:[#allocation6 + $0x28] sm:$0xff]   ;;  %v702_v8 = vld [vmem:[#allocation6 + $0x30] sm:$0xff]   ;;  %s756_s15 = scalar_lea.vmem %s491_s14, 1024  ;;  %p761_p3 = scmp.lt.s32.totalorder %s491_s14, %s491_s14 }
  0x2a   :  { %643 = vmatprep.subr.bf16.mxu0 %v697_v1  ;;  %674 = vmatprep.subr.bf16.mxu1 %v697_v1  ;;  %v708_v6 = vld [vmem:[#allocation3 + $0x20] sm:$0xff]   ;;  %v703_v9 = vld [vmem:[#allocation6 + $0x38] sm:$0xff]   ;;  %v705_v10 = vld [vmem:[#allocation3 + $0x8] sm:$0xff]   ;;  %p757_p2 = scmp.ne.s32.totalorder %s491_s14, %s756_s15  ;;  %p762_p4 = scmp.lt.s32.totalorder %s756_s15, %s756_s15 }
  0x2b   :  { %657 = vmatprep.mubr.bf16.mxu0 %v704_v4  ;;  %665 = vmatprep.mubr.bf16.mxu1 %v708_v6  ;;  %v709_v11 = vld [vmem:[#allocation3 + $0x28] sm:$0xff]   ;;  %v706_v12 = vld [vmem:[#allocation3 + $0x10] sm:$0xff]   ;;  %v707_v14 = vld [vmem:[#allocation3 + $0x18] sm:$0xff]  }
  0x2c   :  { %v710_v13 = vld [vmem:[#allocation3 + $0x30] sm:$0xff]   ;;  %v711_v15 = vld [vmem:[#allocation3 + $0x38] sm:$0xff]   ;;  %p763_p5 = por %p762_p4, %p761_p3 }
  0x2d   :  { %644 = vmatpush3.bf16.msra.mxu0 %v697_v1  ;;  %682 = vmatpush3.bf16.msra.mxu1 %v697_v1 }
  0x2e   :  { %645 = vmatprep.subr.bf16.mxu0 %v698_v2  ;;  %675 = vmatprep.subr.bf16.mxu1 %v698_v2  ;;  %p764_p6 = pnand %p763_p5, %p757_p2 }
  0x31   :  { %646 = vmatpush3.bf16.msra.mxu0 %v698_v2  ;;  %683 = vmatpush3.bf16.msra.mxu1 %v698_v2 }
  0x32   :  { %647 = vmatprep.subr.bf16.mxu0 %v699_v3  ;;  %676 = vmatprep.subr.bf16.mxu1 %v699_v3 }
  0x35   :  { %648 = vmatpush3.bf16.msra.mxu0 %v699_v3  ;;  %684 = vmatpush3.bf16.msra.mxu1 %v699_v3 }
  0x36   :  { %649 = vmatprep.subr.bf16.mxu0 %v700_v5  ;;  %677 = vmatprep.subr.bf16.mxu1 %v700_v5 }
  0x39   :  { %650 = vmatpush3.bf16.msra.mxu0 %v700_v5  ;;  %685 = vmatpush3.bf16.msra.mxu1 %v700_v5 }
  0x3a   :  { %651 = vmatprep.subr.bf16.mxu0 %v701_v7  ;;  %678 = vmatprep.subr.bf16.mxu1 %v701_v7 }
  0x3d   :  { %652 = vmatpush3.bf16.msra.mxu0 %v701_v7  ;;  %686 = vmatpush3.bf16.msra.mxu1 %v701_v7 }
  0x3e   :  { %653 = vmatprep.subr.bf16.mxu0 %v702_v8  ;;  %679 = vmatprep.subr.bf16.mxu1 %v702_v8 }
  0x41   :  { %654 = vmatpush3.bf16.msra.mxu0 %v702_v8  ;;  %687 = vmatpush3.bf16.msra.mxu1 %v702_v8 }
  0x42   :  { %655 = vmatprep.subr.bf16.mxu0 %v703_v9  ;;  %680 = vmatprep.subr.bf16.mxu1 %v703_v9 }
  0x45   :  { %656 = vmatpush3.bf16.msra.mxu0 %v703_v9  ;;  %688 = vmatpush3.bf16.msra.mxu1 %v703_v9 }
  0x48   :  { %658 = vmatmul.mubr.bf16.vlgmr.msra.gmra.mrb[0].mxu0 %v705_v10  ;;  %666 = vmatmul.mubr.bf16.vlgmr.msra.gmra.mrb[0].mxu1 %v709_v11 }
  0x49   :  { %661 = vmatprep.mubr.bf16.mxu0 %v706_v12  ;;  %669 = vmatprep.mubr.bf16.mxu1 %v710_v13 }
  0x50   :  { %662 = vmatmul.mubr.bf16.gmra.mrb[4].mxu0 %v707_v14  ;;  %670 = vmatmul.mubr.bf16.gmra.mrb[4].mxu1 %v711_v15 }
 0x11b   :  { %v659_v16 = vpop.f32.mrb[0].mxu0  ;;  %v892_v17 = vpop.f32.mrb[0].mxu1 }
 0x11c   :  { %v243_v18 = vpop.f32.mrb[1].mxu0  ;;  %v894_v19 = vpop.f32.mrb[1].mxu1  ;;  %v455_v31 = vmul.f32 %v659_v16, %v659_v16 }
 0x11d   :  { %v660_v20 = vpop.f32.mrb[2].mxu0  ;;  %v896_v21 = vpop.f32.mrb[2].mxu1  ;;  %v453_v22 = vmul.f32 %v243_v18, %v243_v18  ;;  %v461_v61 = vmul.f32 %v894_v19, %v894_v19 }
 0x11e   :  { %v586_v23 = vpack.c.bf16 %v660_v20, %v659_v16  ;;  %v246_v24 = vpop.f32.mrb[3].mxu0  ;;  %v606_v25 = vpack.c.bf16 %v896_v21, %v892_v17  ;;  %v900_v26 = vpop.f32.mrb[3].mxu1  ;;  %v456_v34 = vmul.f32 %v660_v20, %v660_v20 }
 0x11f   :  { %v581_v27 = vpack.c.bf16 %v246_v24, %v243_v18  ;;  %v437_v28 = vadd.f32 %v246_v24, %v243_v18  ;;  %v454_v29 = vmul.f32 %v246_v24, %v246_v24  ;;  %v601_v30 = vpack.c.bf16 %v900_v26, %v894_v19 }
 0x120   :  { %618 = vst [vmem:[#allocation8 + $0x8] sm:$0xff] %v586_v23   ;;  %622 = vst [vmem:[#allocation8 + $0x28] sm:$0xff] %v606_v25  }
 0x121   :  { %582 = vst [vmem:[#allocation8] sm:$0xff] %v581_v27   ;;  %v438_v32 = vadd.f32 %v659_v16, %v437_v28  ;;  %v469_v33 = vadd.f32 %v454_v29, %v453_v22  ;;  %621 = vst [vmem:[#allocation8 + $0x20] sm:$0xff] %v601_v30  }
 0x123   :  { %v470_v35 = vadd.f32 %v469_v33, %v455_v31  ;;  %v663_v36 = vpop.f32.mrb[4].mxu0  ;;  %v439_v37 = vadd.f32 %v660_v20, %v438_v32  ;;  %v904_v38 = vpop.f32.mrb[4].mxu1 }
 0x124   :  { %v259_v39 = vpop.f32.mrb[5].mxu0  ;;  %v291_v40 = vpop.f32.mrb[5].mxu1  ;;  %v459_v55 = vmul.f32 %v663_v36, %v663_v36 }
 0x125   :  { %v440_v41 = vadd.f32 %v439_v37, %v259_v39  ;;  %v457_v42 = vmul.f32 %v259_v39, %v259_v39  ;;  %v471_v43 = vadd.f32 %v470_v35, %v456_v34  ;;  %v664_v44 = vpop.f32.mrb[6].mxu0  ;;  %v906_v45 = vpop.f32.mrb[6].mxu1 }
 0x126   :  { %v596_v46 = vpack.c.bf16 %v664_v44, %v663_v36  ;;  %v262_v47 = vpop.f32.mrb[7].mxu0  ;;  %v616_v48 = vpack.c.bf16 %v906_v45, %v904_v38  ;;  %v294_v49 = vpop.f32.mrb[7].mxu1  ;;  %v460_v58 = vmul.f32 %v664_v44, %v664_v44 }
 0x127   :  { %v472_v50 = vadd.f32 %v471_v43, %v457_v42  ;;  %v591_v51 = vpack.c.bf16 %v262_v47, %v259_v39  ;;  %v441_v52 = vadd.f32 %v440_v41, %v262_v47  ;;  %v458_v53 = vmul.f32 %v262_v47, %v262_v47 }
 0x128   :  { %620 = vst [vmem:[#allocation8 + $0x18] sm:$0xff] %v596_v46   ;;  %624 = vst [vmem:[#allocation8 + $0x38] sm:$0xff] %v616_v48   ;;  %v611_v54 = vpack.c.bf16 %v294_v49, %v291_v40 }
 0x129   :  { %619 = vst [vmem:[#allocation8 + $0x10] sm:$0xff] %v591_v51   ;;  %v442_v56 = vadd.f32 %v663_v36, %v441_v52  ;;  %v473_v57 = vadd.f32 %v472_v50, %v458_v53 }
 0x12a   :  { %623 = vst [vmem:[#allocation8 + $0x30] sm:$0xff] %v611_v54  }
 0x12b   :  { %v474_v59 = vadd.f32 %v473_v57, %v459_v55  ;;  %v443_v60 = vadd.f32 %v664_v44, %v442_v56 }
 0x12c   :  { %767 = shalt.err (!%p764_p6)
}
 0x12d   :  { %s768_s18 = scalar_lea.hbm %s969_s2, 1024 }
 0x12e   :  { %p769_p7 = scmp.ne.s32.totalorder %s969_s2, %s768_s18  ;;  %p772_p8 = scmp.lt.u32.totalorder %s768_s18, %s969_s2 }
 0x130   :  { %p774_p9 = pnand %p772_p8, %p769_p7 }
 0x132   :  { %777 = shalt.err (!%p774_p9)
}
 0x133   :  { %496 = dma.vmem_to_hbm [thread:$0]  %s491_s14, 1024, %s969_s2, [#allocation5], %s831_s25, %s831_s25, %s832_s26   ;;  %v444_v62 = vadd.f32 %v443_v60, %v894_v19  ;;  %v475_v63 = vadd.f32 %v474_v59, %v460_v58  ;;  %v462_v2 = vmul.f32 %v900_v26, %v900_v26  ;;  %v463_v3 = vmul.f32 %v892_v17, %v892_v17 }
 0x134   :  { %v464_v6 = vmul.f32 %v896_v21, %v896_v21  ;;  %v465_v9 = vmul.f32 %v291_v40, %v291_v40  ;;  %v466_v14 = vmul.f32 %v294_v49, %v294_v49  ;;  %s835_s2 = smov [#allocation9]   ;;  %v467_v15 = vmul.f32 %v904_v38, %v904_v38  ;;  %s836_s26 = smov [#allocation11]  }
 0x135   :  { %v476_v0 = vadd.f32 %v475_v63, %v461_v61  ;;  %v445_v1 = vadd.f32 %v444_v62, %v900_v26  ;;  %s503_s25 = sshll.u32 %s835_s2, 4  ;;  %s513_s27 = sshll.u32 %s836_s26, 4  ;;  %v468_v18 = vmul.f32 %v906_v45, %v906_v45  ;;  %s504_s25 = int_to_ptr.vmem [resolvable:$true] %s503_s25  ;;  %s514_s27 = int_to_ptr.vmem [resolvable:$true] %s513_s27 }
 0x136   :  { %s778_s28 = scalar_lea.vmem %s504_s25, 128  ;;  %p783_p11 = scmp.lt.s32.totalorder %s504_s25, %s504_s25 }
 0x137   :  { %v446_v4 = vadd.f32 %v892_v17, %v445_v1  ;;  %v477_v5 = vadd.f32 %v476_v0, %v462_v2  ;;  %p779_p10 = scmp.ne.s32.totalorder %s504_s25, %s778_s28  ;;  %p784_p12 = scmp.lt.s32.totalorder %s778_s28, %s778_s28 }
 0x139   :  { %v478_v7 = vadd.f32 %v477_v5, %v463_v3  ;;  %v447_v8 = vadd.f32 %v896_v21, %v446_v4  ;;  %p785_p13 = por %p784_p12, %p783_p11 }
 0x13b   :  { %v448_v10 = vadd.f32 %v447_v8, %v291_v40  ;;  %v479_v11 = vadd.f32 %v478_v7, %v464_v6  ;;  %p786_p0 = pnand %p785_p13, %p779_p10 }
 0x13d   :  { %v480_v12 = vadd.f32 %v479_v11, %v465_v9  ;;  %v449_v13 = vadd.f32 %v448_v10, %v294_v49 }
 0x13f   :  { %v450_v16 = vadd.f32 %v904_v38, %v449_v13  ;;  %v481_v17 = vadd.f32 %v480_v12, %v466_v14 }
 0x141   :  { %v482_v19 = vadd.f32 %v481_v17, %v467_v15  ;;  %v451_v20 = vadd.f32 %v906_v45, %v450_v16 }
 0x143   :  { %452 = vst [vmem:[#allocation9] sm:$0xff] %v451_v20  ;;  %v483_v21 = vadd.f32 %v482_v19, %v468_v18 }
 0x144   :  { %789 = shalt.err (!%p786_p0)
}
 0x145   :  { %s790_s5 = scalar_lea.hbm %s970_s3, 128 }
 0x146   :  { %p791_p1 = scmp.ne.s32.totalorder %s970_s3, %s790_s5  ;;  %p794_p2 = scmp.lt.u32.totalorder %s790_s5, %s970_s3 }
 0x148   :  { %p796_p3 = pnand %p794_p2, %p791_p1 }
 0x14a   :  { %799 = shalt.err (!%p796_p3)
}
 0x14b   :  { %506 = dma.vmem_to_hbm [thread:$0]  %s504_s25, 128, %s970_s3, [#allocation10]   ;;  %484 = vst [vmem:[#allocation11] sm:$0xff] %v483_v21 }
 0x14c   :  { %s800_s12 = scalar_lea.vmem %s514_s27, 128  ;;  %p805_p5 = scmp.lt.s32.totalorder %s514_s27, %s514_s27 }
 0x14d   :  { %p801_p4 = scmp.ne.s32.totalorder %s514_s27, %s800_s12  ;;  %p806_p6 = scmp.lt.s32.totalorder %s800_s12, %s800_s12 }
 0x14f   :  { %p807_p7 = por %p806_p6, %p805_p5 }
 0x151   :  { %p808_p8 = pnand %p807_p7, %p801_p4 }
 0x153   :  { %811 = shalt.err (!%p808_p8)
}
 0x154   :  { %s812_s1 = scalar_lea.hbm %s971_s4, 128 }
 0x155   :  { %p813_p9 = scmp.ne.s32.totalorder %s971_s4, %s812_s1  ;;  %p816_p10 = scmp.lt.u32.totalorder %s812_s1, %s971_s4 }
 0x157   :  { %p818_p11 = pnand %p816_p10, %p813_p9 }
 0x159   :  { %821 = shalt.err (!%p818_p11)
}
 0x15a   :  { %516 = dma.vmem_to_hbm [thread:$0]  %s514_s27, 128, %s971_s4, [#allocation10]  }
 0x15b   :  { %826 = dma.done.wait [#allocation5], 1024  }
 0x15c   :  { %827 = vsyncadd [#allocation5], 4294966272 }
 0x15d   :  { %828 = dma.done.wait [#allocation10], 256  }
 0x15e   :  { %829 = vsyncadd [#allocation10], 4294967040 }
 0x15f   :  { %526 = vsyncpa [#allocation4], 1 }
 0x160   :  { %527 = vsyncpa [#allocation7], 1 }
 0x161   :  { %528 = vsyncpa [#allocation5], 1 }
 0x162   :  { %529 = vsyncpa [#allocation10], 1 }

</bundles_post_ra>
